<compile_context>
chip_gen: v7x
topology: tpu7x:2x2x1
jax: 0.10.0
libtpu: 0.0.40
codegen_flags: <defaults>
</compile_context>

<pallas_src>
import functools
from typing import NamedTuple

import jax
import jax.numpy as jnp
from jax.experimental import pallas as pl
from jax.experimental.pallas import tpu as pltpu


# ----------------------------- parameter setup ------------------------------

def _init_linear(key, fan_in, fan_out, dtype=jnp.float32):
    """PyTorch nn.Linear default init: U(-1/sqrt(fan_in), 1/sqrt(fan_in))."""
    kw, kb = jax.random.split(key)
    bound = 1.0 / jnp.sqrt(jnp.asarray(fan_in, dtype))
    # Stored as [in, out] (already transposed relative to torch's [out, in]).
    W = jax.random.uniform(kw, (fan_in, fan_out), dtype, -bound, bound)
    b = jax.random.uniform(kb, (fan_out,), dtype, -bound, bound)
    return W, b


def make_dueling_params(key, input_channels, output_channels,
                        inner_channels=64, inner_layers=3):
    keys = jax.random.split(key, 2 + inner_layers + 2)
    hidden = [_init_linear(keys[0], input_channels, inner_channels)]
    for i in range(inner_layers):
        hidden.append(_init_linear(keys[1 + i], inner_channels, inner_channels))
    base = _init_linear(keys[1 + inner_layers], inner_channels, 1)     # value head
    adv = _init_linear(keys[2 + inner_layers], inner_channels, output_channels)
    return hidden, base, adv


class PackedParams(NamedTuple):
    Wst: jax.Array   # [L+1, H, H]   compute_dtype (layer-0 rows >= in_dim are zero)
    bst: jax.Array   # [L+1, 1, H]   f32
    Wd: jax.Array    # [H, N_pad]    head_dtype (folded dueling head, lane-padded)
    bd: jax.Array    # [1, N_pad]    f32


def pack_dueling_params(hidden_params, base_params, adv_params, *,
                        compute_dtype=jnp.bfloat16, head_dtype=jnp.float32,
                        lane_pad=128):
    """One-time fold + stack + cast. Call when params change, NOT per forward."""
    (W0, b0), inner = hidden_params[0], hidden_params[1:]
    assert len(inner) >= 1, "expected at least one inner (HxH) layer"
    H = inner[0][0].shape[0]
    in_dim = W0.shape[0]
    assert in_dim <= H, "stacked layer-0 packing assumes input_channels <= inner_channels"
    # TODO(synk): if input_channels > inner_channels, keep layer 0 as a separate operand.

    W0p = jnp.zeros((H, H), jnp.float32).at[:in_dim, :].set(W0)
    Wst = jnp.stack([W0p] + [W for W, _ in inner]).astype(compute_dtype)        # [L+1,H,H]
    bst = jnp.stack([b0.reshape(1, -1)] +
                    [b.reshape(1, -1) for _, b in inner]).astype(jnp.float32)   # [L+1,1,H]

    Wb, bb = base_params       # [H, 1], [1]
    Wa, ba = adv_params        # [H, N], [N]
    n = Wa.shape[1]
    hi = jax.lax.Precision.HIGHEST
    # C = I - ones/N  (exact centering matrix); value head broadcasts over all N cols.
    C = jnp.eye(n, dtype=jnp.float32) - jnp.float32(1.0 / n)
    Wd = jnp.dot(Wa, C, precision=hi) + jnp.tile(Wb, (1, n))   # [H, N]
    bd = jnp.dot(ba, C, precision=hi) + bb                     # [N]

    if lane_pad:
        n_pad = pl.cdiv(n, lane_pad) * lane_pad
        if n_pad != n:  # zero-pad output columns -> unmasked lane-dense stores
            Wd = jnp.pad(Wd, ((0, 0), (0, n_pad - n)))
            bd = jnp.pad(bd, ((0, n_pad - n),))

    return PackedParams(Wst=Wst, bst=bst,
                        Wd=Wd.astype(head_dtype),
                        bd=bd.reshape(1, -1).astype(jnp.float32))


# ------------------------- generation-aware tiling ---------------------------

def _num_tensorcores_per_chip():
    try:
        kind = jax.devices()[0].device_kind.lower()
    except Exception:
        return 1
    if "lite" in kind or "v5e" in kind or "v6" in kind:
        return 1              # single-TC chips
    if "v4" in kind or "v5" in kind or "v7" in kind:
        return 2              # dual-TC / megacore chips (v4, v5p, v7x)
    return 1


def auto_batch_block(batch, *, min_tb=16):
    """None on single-TC chips (grid overhead is pure loss); on dual-TC chips a tile
    size giving exactly one block per TensorCore. VMEM is nowhere near binding here,
    so the tile is sized purely to minimize grid steps."""
    n_tc = _num_tensorcores_per_chip()
    if n_tc <= 1 or batch <= min_tb:
        return None
    tb = -(-batch // n_tc)                  # ceil(batch / n_tc)
    tb = -(-tb // min_tb) * min_tb          # round up to sublane-friendly multiple
    return tb


# --------------------------------- kernel -----------------------------------

def _dueling_kernel(n_layers, in_dim, compute_dtype, head_dtype,
                    x_ref, wst_ref, bst_ref, wd_ref, bd_ref, o_ref):
    # Layer 0: [B, in_dim] @ [in_dim, H]  (slice the zero-padded stacked weight).
    h = x_ref[...].astype(compute_dtype)
    w0 = wst_ref[0]
    if in_dim < w0.shape[0]:
        w0 = w0[:in_dim, :]
    h = jnp.dot(h, w0, preferred_element_type=jnp.float32)
    h = jnp.maximum(h + bst_ref[0], 0.0).astype(compute_dtype)
    # Remaining stacked layers (statically unrolled): [B, H] @ [H, H].
    for i in range(1, n_layers):
        h = jnp.dot(h, wst_ref[i], preferred_element_type=jnp.float32)
        h = jnp.maximum(h + bst_ref[i], 0.0).astype(compute_dtype)
    # Folded dueling head: one [B, H] @ [H, N_pad] matmul + bias, lane-dense store.
    out = jnp.dot(h.astype(head_dtype), wd_ref[...],
                  preferred_element_type=jnp.float32) + bd_ref[...]
    o_ref[...] = out.astype(o_ref.dtype)


# -------------------------------- wrapper ------------------------------------

def dueling_forward(x, packed: PackedParams, *, out_dim, batch_block=None,
                    out_dtype=jnp.bfloat16, slice_output=True):
    """Pallas forward pass equivalent to the dueling Q-net forward.

    packed:       precomputed PackedParams (fold/stack/cast already done).
    batch_block:  None -> single program (grid=()); int -> parallel batch grid
                  (use auto_batch_block() for a generation-aware choice).
    out_dtype:    kernel output dtype (bf16 halves the dominant HBM writeback).
    slice_output: if False, return the padded [Bp, N_pad] buffer and slice at the
                  consumer; jit this wrapper so the slice fuses either way.
    """
    B, in_dim = x.shape
    n_layers = packed.Wst.shape[0]
    n_pad = packed.Wd.shape[1]
    compute_dtype = packed.Wst.dtype
    head_dtype = packed.Wd.dtype

    kernel = functools.partial(_dueling_kernel, n_layers, in_dim,
                               compute_dtype, head_dtype)
    operands = (x, packed.Wst, packed.bst, packed.Wd, packed.bd)

    if batch_block is not None and B > batch_block:
        TB = int(batch_block)
        min_tb = 16 if compute_dtype == jnp.bfloat16 else 8
        assert TB % min_tb == 0, (
            f"batch_block must be a multiple of {min_tb} for {compute_dtype} activations")
        n_blocks = pl.cdiv(B, TB)
        Bp = n_blocks * TB
        xg = jnp.pad(x, ((0, Bp - B), (0, 0))) if Bp != B else x
        out = pl.pallas_call(
            kernel,
            out_shape=jax.ShapeDtypeStruct((Bp, n_pad), out_dtype),
            grid=(n_blocks,),
            in_specs=[
                pl.BlockSpec((TB, in_dim), lambda i: (i, 0)),       # x tiled over batch
                pl.BlockSpec(packed.Wst.shape, lambda i: (0, 0, 0)),  # weights VMEM-resident
                pl.BlockSpec(packed.bst.shape, lambda i: (0, 0, 0)),
                pl.BlockSpec(packed.Wd.shape, lambda i: (0, 0)),
                pl.BlockSpec(packed.bd.shape, lambda i: (0, 0)),
            ],
            out_specs=pl.BlockSpec((TB, n_pad), lambda i: (i, 0)),
            compiler_params=pltpu.CompilerParams(
                dimension_semantics=("parallel",)),
        )(xg, *operands[1:])
        if slice_output:
            out = out[:B, :out_dim]
        return out

    # Single program: grid=(), everything VMEM-resident, no per-step overhead.
    vmem = pl.BlockSpec(memory_space=pltpu.MemorySpace.VMEM)
    out = pl.pallas_call(
        kernel,
        out_shape=jax.ShapeDtypeStruct((B, n_pad), out_dtype),
        in_specs=[vmem] * 5,
        out_specs=vmem,
    )(*operands)
    if slice_output:
        out = out[:, :out_dim]
    return out


# ------------------------------- references ----------------------------------

def dueling_forward_ref(x, hidden_params, base_params, adv_params):
    """Pure-JAX mirror of the PyTorch forward (unfolded, full f32 matmuls)."""
    hi = jax.lax.Precision.HIGHEST
    h = x
    for W, b in hidden_params:
        h = jnp.maximum(jnp.dot(h, W, precision=hi) + b, 0.0)
    base = jnp.dot(h, base_params[0], precision=hi) + base_params[1]
    adv = jnp.dot(h, adv_params[0], precision=hi) + adv_params[1]
    return base + (adv - adv.mean(axis=1, keepdims=True))


def dueling_forward_matched_ref(x, packed: PackedParams, out_dim, out_dtype):
    """Pure-JAX reference mirroring the kernel's fold / dtype policy exactly."""
    in_dim = x.shape[1]
    cd = packed.Wst.dtype
    h = x.astype(cd)
    w0 = packed.Wst[0][:in_dim, :]
    h = jnp.dot(h, w0, preferred_element_type=jnp.float32)
    h = jnp.maximum(h + packed.bst[0], 0.0).astype(cd)
    for i in range(1, packed.Wst.shape[0]):
        h = jnp.dot(h, packed.Wst[i], preferred_element_type=jnp.float32)
        h = jnp.maximum(h + packed.bst[i], 0.0).astype(cd)
    out = jnp.dot(h.astype(packed.Wd.dtype), packed.Wd,
                  preferred_element_type=jnp.float32) + packed.bd
    return out.astype(out_dtype)[:, :out_dim]


# ----------------------------------- main -------------------------------------

if __name__ == "__main__":
    key = jax.random.PRNGKey(0)
    k_params, k_x1, k_x2 = jax.random.split(key, 3)

    input_channels, output_channels = 16, 8
    inner_channels, inner_layers = 64, 3

    hidden_params, base_params, adv_params = make_dueling_params(
        k_params, input_channels, output_channels, inner_channels, inner_layers)

    # Pack / fold / cast ONCE — hoisted out of the per-step forward path.
    packed = pack_dueling_params(hidden_params, base_params, adv_params,
                                 compute_dtype=jnp.bfloat16,   # MXU-native inputs
                                 head_dtype=jnp.float32)       # exact dueling centering

    fwd = jax.jit(dueling_forward,
                  static_argnames=("out_dim", "batch_block", "out_dtype", "slice_output"))

    def _f32(a):
        return jnp.asarray(a, jnp.float32)

    # ---- Path 1: small batch -> single program (grid=()), bf16 compute/output ----
    x_small = jax.random.normal(k_x1, (8, input_channels), jnp.float32)
    out_small = jax.block_until_ready(fwd(x_small, packed, out_dim=output_channels))
    assert out_small.shape == (8, output_channels)
    assert out_small.dtype == jnp.bfloat16
    ref_small = dueling_forward_ref(x_small, hidden_params, base_params, adv_params)
    mref_small = dueling_forward_matched_ref(x_small, packed, output_channels, jnp.bfloat16)
    assert jnp.allclose(_f32(out_small), _f32(mref_small), atol=1e-2, rtol=1e-2), \
        "single-program path mismatch vs matched reference"
    assert float(jnp.max(jnp.abs(_f32(out_small) - ref_small))) < 5e-2, \
        "single-program path drift vs f32 reference too large"

    # ---- Path 2: batch grid with exactly 2 parallel blocks (v7x dual-TC shape) ----
    B = 64
    x_big = jax.random.normal(k_x2, (B, input_channels), jnp.float32)
    out_big = jax.block_until_ready(
        fwd(x_big, packed, out_dim=output_channels, batch_block=32))
    assert out_big.shape == (B, output_channels)
    ref_big = dueling_forward_ref(x_big, hidden_params, base_params, adv_params)
    mref_big = dueling_forward_matched_ref(x_big, packed, output_channels, jnp.bfloat16)
    assert jnp.allclose(_f32(out_big), _f32(mref_big), atol=1e-2, rtol=1e-2), \
        "gridded path mismatch vs matched reference"
    assert float(jnp.max(jnp.abs(_f32(out_big) - ref_big))) < 5e-2, \
        "gridded path drift vs f32 reference too large"

    # ---- Path 3: generation-aware auto tiling (None on v5e/v6e, 2 blocks on v7x) ----
    out_auto = jax.block_until_ready(
        fwd(x_big, packed, out_dim=output_channels, batch_block=auto_batch_block(B)))
    assert jnp.allclose(_f32(out_auto), _f32(out_big), atol=1e-2, rtol=1e-2), \
        "auto-tiled path disagrees with fixed-tile path"

    print("KERNEL_OK")
</pallas_src>

<mosaic_0001>
module attributes {stable_mosaic.version = 11 : i64} {
  func.func @_dueling_kernel(%arg0: memref<8x16xf32, #tpu.memory_space<vmem>>, %arg1: memref<4x64x64xbf16, #tpu.memory_space<vmem>>, %arg2: memref<4x1x64xf32, #tpu.memory_space<vmem>>, %arg3: memref<64x128xf32, #tpu.memory_space<vmem>>, %arg4: memref<1x128xf32, #tpu.memory_space<vmem>>, %arg5: memref<8x128xbf16, #tpu.memory_space<vmem>>) attributes {dimension_semantics = [], scalar_prefetch = 0 : i64, scratch_operands = 0 : i64, tpu.core_type = #tpu.core_type<tc>} {
    %c0 = arith.constant 0 : index
    %c0_0 = arith.constant 0 : index
    %0 = vector.load %arg0[%c0, %c0_0] : memref<8x16xf32, #tpu.memory_space<vmem>>, vector<8x16xf32>
    %1 = arith.truncf %0 : vector<8x16xf32> to vector<8x16xbf16>
    %c0_1 = arith.constant 0 : index
    %c0_2 = arith.constant 0 : index
    %c0_3 = arith.constant 0 : index
    %2 = vector.load %arg1[%c0_1, %c0_2, %c0_3] : memref<4x64x64xbf16, #tpu.memory_space<vmem>>, vector<1x64x64xbf16>
    %3 = vector.shape_cast %2 : vector<1x64x64xbf16> to vector<64x64xbf16>
    %4 = vector.extract_strided_slice %3 {offsets = [0, 0], sizes = [16, 64], strides = [1, 1]} : vector<64x64xbf16> to vector<16x64xbf16>
    %cst = arith.constant dense<0.000000e+00> : vector<8x64xf32>
    %5 = tpu.matmul %1, %4, %cst {dimension_numbers = #tpu.dot_dimension_numbers<[1], [0], [0], [1], [0, 0, 1, 1], [], []>} : vector<8x16xbf16>, vector<16x64xbf16>, vector<8x64xf32> -> vector<8x64xf32>
    %c0_4 = arith.constant 0 : index
    %c0_5 = arith.constant 0 : index
    %c0_6 = arith.constant 0 : index
    %6 = vector.load %arg2[%c0_4, %c0_5, %c0_6] : memref<4x1x64xf32, #tpu.memory_space<vmem>>, vector<1x1x64xf32>
    %7 = vector.shape_cast %6 : vector<1x1x64xf32> to vector<1x64xf32>
    %8 = vector.broadcast %7 : vector<1x64xf32> to vector<8x64xf32>
    %9 = arith.addf %5, %8 : vector<8x64xf32>
    %cst_7 = arith.constant 0.000000e+00 : f32
    %10 = vector.broadcast %cst_7 : f32 to vector<8x64xf32>
    %11 = arith.maximumf %9, %10 : vector<8x64xf32>
    %12 = arith.truncf %11 : vector<8x64xf32> to vector<8x64xbf16>
    %c1 = arith.constant 1 : index
    %c0_8 = arith.constant 0 : index
    %c0_9 = arith.constant 0 : index
    %13 = vector.load %arg1[%c1, %c0_8, %c0_9] : memref<4x64x64xbf16, #tpu.memory_space<vmem>>, vector<1x64x64xbf16>
    %14 = vector.shape_cast %13 : vector<1x64x64xbf16> to vector<64x64xbf16>
    %cst_10 = arith.constant dense<0.000000e+00> : vector<8x64xf32>
    %15 = tpu.matmul %12, %14, %cst_10 {dimension_numbers = #tpu.dot_dimension_numbers<[1], [0], [0], [1], [0, 0, 1, 1], [], []>} : vector<8x64xbf16>, vector<64x64xbf16>, vector<8x64xf32> -> vector<8x64xf32>
    %c1_11 = arith.constant 1 : index
    %c0_12 = arith.constant 0 : index
    %c0_13 = arith.constant 0 : index
    %16 = vector.load %arg2[%c1_11, %c0_12, %c0_13] : memref<4x1x64xf32, #tpu.memory_space<vmem>>, vector<1x1x64xf32>
    %17 = vector.shape_cast %16 : vector<1x1x64xf32> to vector<1x64xf32>
    %18 = vector.broadcast %17 : vector<1x64xf32> to vector<8x64xf32>
    %19 = arith.addf %15, %18 : vector<8x64xf32>
    %cst_14 = arith.constant 0.000000e+00 : f32
    %20 = vector.broadcast %cst_14 : f32 to vector<8x64xf32>
    %21 = arith.maximumf %19, %20 : vector<8x64xf32>
    %22 = arith.truncf %21 : vector<8x64xf32> to vector<8x64xbf16>
    %c2 = arith.constant 2 : index
    %c0_15 = arith.constant 0 : index
    %c0_16 = arith.constant 0 : index
    %23 = vector.load %arg1[%c2, %c0_15, %c0_16] : memref<4x64x64xbf16, #tpu.memory_space<vmem>>, vector<1x64x64xbf16>
    %24 = vector.shape_cast %23 : vector<1x64x64xbf16> to vector<64x64xbf16>
    %cst_17 = arith.constant dense<0.000000e+00> : vector<8x64xf32>
    %25 = tpu.matmul %22, %24, %cst_17 {dimension_numbers = #tpu.dot_dimension_numbers<[1], [0], [0], [1], [0, 0, 1, 1], [], []>} : vector<8x64xbf16>, vector<64x64xbf16>, vector<8x64xf32> -> vector<8x64xf32>
    %c2_18 = arith.constant 2 : index
    %c0_19 = arith.constant 0 : index
    %c0_20 = arith.constant 0 : index
    %26 = vector.load %arg2[%c2_18, %c0_19, %c0_20] : memref<4x1x64xf32, #tpu.memory_space<vmem>>, vector<1x1x64xf32>
    %27 = vector.shape_cast %26 : vector<1x1x64xf32> to vector<1x64xf32>
    %28 = vector.broadcast %27 : vector<1x64xf32> to vector<8x64xf32>
    %29 = arith.addf %25, %28 : vector<8x64xf32>
    %cst_21 = arith.constant 0.000000e+00 : f32
    %30 = vector.broadcast %cst_21 : f32 to vector<8x64xf32>
    %31 = arith.maximumf %29, %30 : vector<8x64xf32>
    %32 = arith.truncf %31 : vector<8x64xf32> to vector<8x64xbf16>
    %c3 = arith.constant 3 : index
    %c0_22 = arith.constant 0 : index
    %c0_23 = arith.constant 0 : index
    %33 = vector.load %arg1[%c3, %c0_22, %c0_23] : memref<4x64x64xbf16, #tpu.memory_space<vmem>>, vector<1x64x64xbf16>
    %34 = vector.shape_cast %33 : vector<1x64x64xbf16> to vector<64x64xbf16>
    %cst_24 = arith.constant dense<0.000000e+00> : vector<8x64xf32>
    %35 = tpu.matmul %32, %34, %cst_24 {dimension_numbers = #tpu.dot_dimension_numbers<[1], [0], [0], [1], [0, 0, 1, 1], [], []>} : vector<8x64xbf16>, vector<64x64xbf16>, vector<8x64xf32> -> vector<8x64xf32>
    %c3_25 = arith.constant 3 : index
    %c0_26 = arith.constant 0 : index
    %c0_27 = arith.constant 0 : index
    %36 = vector.load %arg2[%c3_25, %c0_26, %c0_27] : memref<4x1x64xf32, #tpu.memory_space<vmem>>, vector<1x1x64xf32>
    %37 = vector.shape_cast %36 : vector<1x1x64xf32> to vector<1x64xf32>
    %38 = vector.broadcast %37 : vector<1x64xf32> to vector<8x64xf32>
    %39 = arith.addf %35, %38 : vector<8x64xf32>
    %cst_28 = arith.constant 0.000000e+00 : f32
    %40 = vector.broadcast %cst_28 : f32 to vector<8x64xf32>
    %41 = arith.maximumf %39, %40 : vector<8x64xf32>
    %42 = arith.truncf %41 : vector<8x64xf32> to vector<8x64xbf16>
    %43 = arith.extf %42 : vector<8x64xbf16> to vector<8x64xf32>
    %c0_29 = arith.constant 0 : index
    %c0_30 = arith.constant 0 : index
    %44 = vector.load %arg3[%c0_29, %c0_30] : memref<64x128xf32, #tpu.memory_space<vmem>>, vector<64x128xf32>
    %cst_31 = arith.constant dense<0.000000e+00> : vector<8x128xf32>
    %45 = tpu.matmul %43, %44, %cst_31 {dimension_numbers = #tpu.dot_dimension_numbers<[1], [0], [0], [1], [0, 0, 1, 1], [], []>} : vector<8x64xf32>, vector<64x128xf32>, vector<8x128xf32> -> vector<8x128xf32>
    %c0_32 = arith.constant 0 : index
    %c0_33 = arith.constant 0 : index
    %46 = vector.load %arg4[%c0_32, %c0_33] : memref<1x128xf32, #tpu.memory_space<vmem>>, vector<1x128xf32>
    %47 = vector.broadcast %46 : vector<1x128xf32> to vector<8x128xf32>
    %48 = arith.addf %45, %47 : vector<8x128xf32>
    %49 = arith.truncf %48 : vector<8x128xf32> to vector<8x128xbf16>
    %c0_34 = arith.constant 0 : index
    %c0_35 = arith.constant 0 : index
    %50 = vector.load %arg5[%c0_34, %c0_35] : memref<8x128xbf16, #tpu.memory_space<vmem>>, vector<8x128xbf16>
    tpu.vector_store %arg5[%c0_34, %c0_35], %49 {strides = array<i32>} : memref<8x128xbf16, #tpu.memory_space<vmem>>, vector<8x128xbf16>,
    return
  }
}

</mosaic_0001>

<bundles_post_ra>
// kernel: dueling_forward.1
= control target key start
LH: loop header
LB: loop body
LE: loop exit
PB: predicated region body
PF: predicated region fallthrough
CT: control target
= control target key end

     0   :  { %10 = vsyncpa [#allocation3], 0  ;;  %s864_s0 = inlined_call_operand.hbm [shape: f32[8,16], index: 0, kind: input, shape index: {}]   ;;  %s865_s1 = inlined_call_operand.hbm [shape: bf16[4,64,64], index: 1, kind: input, shape index: {}]   ;;  %s866_s2 = inlined_call_operand.vmem [shape: f32[4,1,64], index: 2, kind: input, shape index: {}]   ;;  %s867_s3 = inlined_call_operand.hbm [shape: f32[64,128], index: 3, kind: input, shape index: {}]   ;;  %s868_s4 = inlined_call_operand.vmem [shape: f32[1,128], index: 4, kind: input, shape index: {}]   ;;  %s869_s5 = inlined_call_operand.hbm [shape: bf16[8,128], index: 5, kind: output, shape index: {}]  }
   0x1   :  { %11 = vsyncpa [#allocation6], 0 }
   0x2   :  { %12 = vsyncpa [#allocation4], 0  ;;  %s733_s18 = smov [#allocation5]   ;;  %s639_s22 = scalar_lea.hbm %s865_s1, 2048 }
   0x3   :  { %s28_s19 = sshll.u32 %s733_s18, 4  ;;  %p640_p0 = scmp.ne.s32.totalorder %s865_s1, %s639_s22  ;;  %s29_s19 = int_to_ptr.vmem [resolvable:$true] %s28_s19 }
   0x4   :  { %p643_p1 = scmp.lt.u32.totalorder %s639_s22, %s865_s1 }
   0x6   :  { %p645_p2 = pnand %p643_p1, %p640_p0 }
   0x8   :  { %648 = shalt.err (!%p645_p2)
}
   0x9   :  { %s649_s27 = scalar_lea.vmem %s29_s19, 2048  ;;  %p654_p4 = scmp.lt.s32.totalorder %s29_s19, %s29_s19 }
   0xa   :  { %p650_p3 = scmp.ne.s32.totalorder %s29_s19, %s649_s27  ;;  %p655_p5 = scmp.lt.s32.totalorder %s649_s27, %s649_s27 }
   0xc   :  { %p656_p6 = por %p655_p5, %p654_p4 }
   0xe   :  { %p657_p7 = pnand %p656_p6, %p650_p3 }
  0x10   :  { %660 = shalt.err (!%p657_p7)
}
  0x11   :  { %s734_s28 = smov 64   ;;  %s735_s29 = smov 4  }
  0x12   :  { %34 = dma.hbm_to_vmem [thread:$0]  %s865_s1, 2048, %s29_s19, [#allocation6], %s734_s28, %s734_s28, %s735_s29  }
  0x13   :  { %s736_s7 = smov [#allocation2]   ;;  %s737_s9 = smov [#allocation7]  }
  0x14   :  { %s19_s8 = sshll.u32 %s736_s7, 4  ;;  %s42_s10 = sshll.u32 %s737_s9, 4  ;;  %s20_s8 = int_to_ptr.vmem [resolvable:$true] %s19_s8  ;;  %s43_s10 = int_to_ptr.vmem [resolvable:$true] %s42_s10 }
  0x15   :  { %s661_s13 = scalar_lea.hbm %s864_s0, 128 }
  0x16   :  { %p662_p8 = scmp.ne.s32.totalorder %s864_s0, %s661_s13  ;;  %p665_p9 = scmp.lt.u32.totalorder %s661_s13, %s864_s0 }
  0x18   :  { %p667_p10 = pnand %p665_p9, %p662_p8 }
  0x1a   :  { %670 = shalt.err (!%p667_p10)
}
  0x1b   :  { %s671_s1 = scalar_lea.vmem %s20_s8, 128  ;;  %p676_p12 = scmp.lt.s32.totalorder %s20_s8, %s20_s8 }
  0x1c   :  { %p672_p11 = scmp.ne.s32.totalorder %s20_s8, %s671_s1  ;;  %p677_p13 = scmp.lt.s32.totalorder %s671_s1, %s671_s1 }
  0x1e   :  { %p678_p0 = por %p677_p13, %p676_p12 }
  0x20   :  { %p679_p1 = pnand %p678_p0, %p672_p11 }
  0x22   :  { %682 = shalt.err (!%p679_p1)
}
  0x23   :  { %22 = dma.hbm_to_vmem [thread:$0]  %s864_s0, 128, %s20_s8, [#allocation3]  }
  0x24   :  { %s683_s22 = scalar_lea.hbm %s867_s3, 1024 }
  0x25   :  { %p684_p2 = scmp.ne.s32.totalorder %s867_s3, %s683_s22  ;;  %p687_p3 = scmp.lt.u32.totalorder %s683_s22, %s867_s3 }
  0x27   :  { %p689_p4 = pnand %p687_p3, %p684_p2 }
  0x29   :  { %692 = shalt.err (!%p689_p4)
}
  0x2a   :  { %s693_s27 = scalar_lea.vmem %s43_s10, 1024  ;;  %p698_p6 = scmp.lt.s32.totalorder %s43_s10, %s43_s10 }
  0x2b   :  { %p694_p5 = scmp.ne.s32.totalorder %s43_s10, %s693_s27  ;;  %p699_p7 = scmp.lt.s32.totalorder %s693_s27, %s693_s27 }
  0x2d   :  { %p700_p8 = por %p699_p7, %p698_p6 }
  0x2f   :  { %p701_p9 = pnand %p700_p8, %p694_p5 }
  0x31   :  { %704 = shalt.err (!%p701_p9)
}
  0x32   :  { %s738_s0 = smov 128   ;;  %s739_s28 = smov 8  }
  0x33   :  { %48 = dma.hbm_to_vmem [thread:$0]  %s867_s3, 1024, %s43_s10, [#allocation6], %s738_s0, %s738_s0, %s739_s28  }
  0x34   :  { %727 = dma.done.wait [#allocation3], 128  }
  0x35   :  { %728 = vsyncadd [#allocation3], 4294967168 }
  0x36   :  { %729 = dma.done.wait [#allocation6], 3072  }
  0x37   :  { %730 = vsyncadd [#allocation6], 4294964224  ;;  %v740_v0 = vmov 0.0   ;;  %vm741_vm0 = vmmov 0   ;;  %v626_v1 = vld [vmem:[#allocation5] sm:$0xff]   ;;  %v61_v2 = vld [vmem:[#allocation2] sm:$0xff] }
  0x38   :  { %542 = vmatprep.subr.bf16.mxu0 %v740_v0  ;;  %544 = vmatprep.mubr.msk.bf16.mxu0 %vm741_vm0, %v740_v0  ;;  %v62_v3 = vpack.c.bf16 %v61_v2, %v61_v2  ;;  %vm78_vm1 = vcmask 130048   ;;  %v627_v4 = vld [vmem:[#allocation5 + $0x20] sm:$0xff]   ;;  %v628_v5 = vld [vmem:[#allocation5 + $0x28] sm:$0xff]   ;;  %v629_v6 = vld [vmem:[#allocation5 + $0x30] sm:$0xff]   ;;  %vm165_vm2 = vcmask 523264   ;;  %v742_v35 = vmov 0.0|0.0  }
  0x39   :  { %548 = vmatprep.subr.bf16.mxu1 %v740_v0  ;;  %556 = vmatprep.mubr.msk.bf16.mxu1 %vm741_vm0, %v740_v0  ;;  %v630_v7 = vld [vmem:[#allocation5 + $0x38] sm:$0xff]   ;;  %v631_v8 = vld [vmem:[#allocation5 + $0x40] sm:$0xff]   ;;  %v632_v9 = vld [vmem:[#allocation5 + $0x48] sm:$0xff]   ;;  %s743_s15 = smov [#allocation8]  }
  0x3a   :  { %543 = vmatpush3.bf16.msra.mxu0 %v626_v1  ;;  %549 = vmatpush3.bf16.msra.mxu1 %v627_v4  ;;  %v490_v10 = vld [vmem:[%s866_s2] ss:$0 sm:$0xff]  ;;  %v633_v18 = vld [vmem:[#allocation5 + $0x50] sm:$0xff]   ;;  %v635_v20 = vld [vmem:[#allocation5 + $0x60] sm:$0xff]   ;;  %s480_s16 = sshll.u32 %s743_s15, 4  ;;  %s481_s16 = int_to_ptr.vmem [resolvable:$true] %s480_s16 }
  0x3b   :  { %560 = vmatprep.subr.bf16.mxu0 %v740_v0  ;;  %550 = vmatprep.subr.bf16.mxu1 %v740_v0  ;;  %v634_v19 = vld [vmem:[#allocation5 + $0x58] sm:$0xff]   ;;  %v636_v21 = vld [vmem:[#allocation5 + $0x68] sm:$0xff]   ;;  %v637_v30 = vld [vmem:[#allocation5 + $0x70] sm:$0xff]   ;;  %p710_p11 = scmp.lt.s32.totalorder %s481_s16, %s481_s16 }
  0x3c   :  { %v494_v22 = vld [vmem:[%s866_s2 + $0x1] ss:$0 sm:$0xff]  ;;  %v384_v32 = vld [vmem:[#allocation7] sm:$0xff]  ;;  %v385_v33 = vld [vmem:[#allocation7 + $0x8] sm:$0xff] }
  0x3d   :  { %545 = vmatmul.mubr.msk.bf16.vlgmr.msra.gmra.mrb[0].mxu0 %vm78_vm1, %v62_v3  ;;  %v638_v31 = vld [vmem:[#allocation5 + $0x78] sm:$0xff]   ;;  %v386_v34 = vld [vmem:[#allocation7 + $0x10] sm:$0xff]  ;;  %v604_v36 = vpack.c.bf16 %v385_v33, %v384_v32  ;;  %v388_v39 = vld [vmem:[#allocation7 + $0x20] sm:$0xff] }
  0x3e   :  { %568 = vmatprep.mubr.msk.bf16.mxu0 %vm741_vm0, %v740_v0  ;;  %551 = vmatpush3.bf16.msra.mxu1 %v628_v5  ;;  %v387_v37 = vld [vmem:[#allocation7 + $0x18] sm:$0xff]  ;;  %v389_v40 = vld [vmem:[#allocation7 + $0x28] sm:$0xff]  ;;  %v390_v50 = vld [vmem:[#allocation7 + $0x30] sm:$0xff] }
  0x3f   :  { %552 = vmatprep.subr.bf16.mxu1 %v740_v0  ;;  %561 = vmatpush3.bf16.msra.mxu0 %v631_v8  ;;  %v607_v38 = vpack.c.bf16 %v387_v37, %v386_v34  ;;  %v610_v41 = vpack.c.bf16 %v389_v40, %v388_v39  ;;  %v501_v42 = vld [vmem:[%s866_s2 + $0x2] ss:$0 sm:$0xff]  ;;  %v508_v53 = vld [vmem:[%s866_s2 + $0x3] ss:$0 sm:$0xff]  ;;  %v514_v60 = vld [vmem:[%s868_s4] ss:$0 sm:$0xff] }
  0x40   :  { %562 = vmatprep.subr.bf16.mxu0 %v740_v0  ;;  %v391_v51 = vld [vmem:[#allocation7 + $0x38] sm:$0xff]  ;;  %s705_s2 = scalar_lea.vmem %s481_s16, 64 }
  0x41   :  { %v613_v52 = vpack.c.bf16 %v391_v51, %v390_v50  ;;  %p706_p10 = scmp.ne.s32.totalorder %s481_s16, %s705_s2  ;;  %p711_p12 = scmp.lt.s32.totalorder %s705_s2, %s705_s2 }
  0x42   :  { %553 = vmatpush3.bf16.msra.mxu1 %v629_v6 }
  0x43   :  { %554 = vmatprep.subr.bf16.mxu1 %v740_v0  ;;  %563 = vmatpush3.bf16.msra.mxu0 %v632_v9  ;;  %p712_p13 = por %p711_p12, %p710_p11 }
  0x44   :  { %564 = vmatprep.subr.bf16.mxu0 %v740_v0 }
  0x45   :  { %p713_p0 = pnand %p712_p13, %p706_p10 }
  0x46   :  { %555 = vmatpush3.bf16.msra.mxu1 %v630_v7 }
  0x47   :  { %572 = vmatprep.subr.bf16.mxu1 %v740_v0  ;;  %565 = vmatpush3.bf16.msra.mxu0 %v633_v18 }
  0x48   :  { %566 = vmatprep.subr.bf16.mxu0 %v740_v0 }
  0x4b   :  { %567 = vmatpush3.bf16.msra.mxu0 %v634_v19 }
  0x4c   :  { %603 = vmatprep.subr.bf16.mxu0 %v742_v35 }
 0x110   :  { %v116_v11 = vpop.f32.mrb[0].mxu0 }
 0x111   :  { %v117_v12 = vadd.f32 %v490_v10, %v116_v11  ;;  %v546_v13 = vpop.f32.mrb[1].mxu0 }
 0x112   :  { %v119_v14 = vpop.f32.mrb[2].mxu0 }
 0x113   :  { %v122_v15 = vmax.f32 %v117_v12, 0.0  ;;  %v547_v16 = vpop.f32.mrb[3].mxu0 }
 0x115   :  { %v123_v17 = vpack.c.bf16 %v122_v15, %v122_v15 }
 0x117   :  { %557 = vmatmul.mubr.msk.bf16.vlgmr.msra.gmra.mrb[0].mxu1 %vm165_vm2, %v123_v17 }
 0x118   :  { %580 = vmatprep.mubr.msk.bf16.mxu1 %vm741_vm0, %v740_v0  ;;  %573 = vmatpush3.bf16.msra.mxu1 %v635_v20 }
 0x119   :  { %574 = vmatprep.subr.bf16.mxu1 %v740_v0 }
 0x11c   :  { %575 = vmatpush3.bf16.msra.mxu1 %v636_v21 }
 0x11d   :  { %576 = vmatprep.subr.bf16.mxu1 %v740_v0 }
 0x120   :  { %577 = vmatpush3.bf16.msra.mxu1 %v637_v30 }
 0x121   :  { %578 = vmatprep.subr.bf16.mxu1 %v740_v0 }
 0x124   :  { %579 = vmatpush3.bf16.msra.mxu1 %v638_v31 }
 0x1ea   :  { %v203_v23 = vpop.f32.mrb[0].mxu1 }
 0x1eb   :  { %v204_v24 = vadd.f32 %v494_v22, %v203_v23  ;;  %v558_v25 = vpop.f32.mrb[1].mxu1 }
 0x1ec   :  { %v206_v26 = vpop.f32.mrb[2].mxu1 }
 0x1ed   :  { %v209_v27 = vmax.f32 %v204_v24, 0.0  ;;  %v559_v28 = vpop.f32.mrb[3].mxu1 }
 0x1ef   :  { %v210_v29 = vpack.c.bf16 %v209_v27, %v209_v27 }
 0x1f1   :  { %569 = vmatmul.mubr.msk.bf16.vlgmr.msra.gmra.mrb[4].mxu0 %vm165_vm2, %v210_v29 }
 0x1f2   :  { %600 = vmatprep.mubr.msk.f32.mxu0 %vm741_vm0, %v740_v0  ;;  %605 = vmatpush3.bf16.msra.mxu0 %v604_v36 }
 0x1f3   :  { %606 = vmatprep.subr.bf16.mxu0 %v742_v35 }
 0x1f6   :  { %608 = vmatpush3.bf16.msra.mxu0 %v607_v38 }
 0x1f7   :  { %609 = vmatprep.subr.bf16.mxu0 %v742_v35 }
 0x1fa   :  { %611 = vmatpush3.bf16.msra.mxu0 %v610_v41 }
 0x1fb   :  { %612 = vmatprep.subr.bf16.mxu0 %v742_v35 }
 0x1fe   :  { %614 = vmatpush3.bf16.msra.mxu0 %v613_v52 }
 0x2c4   :  { %v289_v43 = vpop.f32.mrb[4].mxu0 }
 0x2c5   :  { %v290_v44 = vadd.f32 %v501_v42, %v289_v43  ;;  %v570_v45 = vpop.f32.mrb[5].mxu0 }
 0x2c6   :  { %v292_v46 = vpop.f32.mrb[6].mxu0 }
 0x2c7   :  { %v295_v47 = vmax.f32 %v290_v44, 0.0  ;;  %v571_v48 = vpop.f32.mrb[7].mxu0 }
 0x2c9   :  { %v296_v49 = vpack.c.bf16 %v295_v47, %v295_v47 }
 0x2cb   :  { %581 = vmatmul.mubr.msk.bf16.vlgmr.msra.gmra.mrb[4].mxu1 %vm165_vm2, %v296_v49 }
 0x39e   :  { %v375_v54 = vpop.f32.mrb[4].mxu1 }
 0x39f   :  { %v376_v55 = vadd.f32 %v508_v53, %v375_v54  ;;  %v582_v56 = vpop.f32.mrb[5].mxu1 }
 0x3a0   :  { %v378_v57 = vpop.f32.mrb[6].mxu1 }
 0x3a1   :  { %v381_v58 = vmax.f32 %v376_v55, 0.0  ;;  %v583_v59 = vpop.f32.mrb[7].mxu1 }
 0x3a3   :  { %601 = vmatmul.mubr.msk.f32.vlgmr.msra.gmra.mrb[8].mxu0 %vm165_vm2, %v381_v58 }
 0x476   :  { %v468_v61 = vpop.f32.mrb[8].mxu0 }
 0x477   :  { %v469_v62 = vadd.f32 %v514_v60, %v468_v61  ;;  %v602_v63 = vpop.f32.mrb[9].mxu0 }
 0x479   :  { %v472_v0 = vpack.c.bf16 %v469_v62, %v469_v62 }
 0x47b   :  { %473 = vst [vmem:[#allocation8] sm:$0xf] %v472_v0 }
 0x47c   :  { %716 = shalt.err (!%p713_p0)
}
 0x47d   :  { %s717_s18 = scalar_lea.hbm %s869_s5, 64 }
 0x47e   :  { %p718_p1 = scmp.ne.s32.totalorder %s869_s5, %s717_s18  ;;  %p721_p2 = scmp.lt.u32.totalorder %s717_s18, %s869_s5 }
 0x480   :  { %p723_p3 = pnand %p721_p2, %p718_p1 }
 0x482   :  { %726 = shalt.err (!%p723_p3)
}
 0x483   :  { %483 = dma.vmem_to_hbm [thread:$0]  %s481_s16, 64, %s869_s5, [#allocation4]  }
 0x484   :  { %731 = dma.done.wait [#allocation4], 64  }
 0x485   :  { %732 = vsyncadd [#allocation4], 4294967232 }
 0x486   :  { %487 = vsyncpa [#allocation3], 1 }
 0x487   :  { %488 = vsyncpa [#allocation6], 1 }
 0x488   :  { %489 = vsyncpa [#allocation4], 1 }

</bundles_post_ra>
